<compile_context>
chip_gen: v7x
topology: tpu7x:2x2x1
jax: 0.10.0
libtpu: 0.0.40
codegen_flags: <defaults>
</compile_context>

<pallas_src>
import jax
import jax.numpy as jnp
from jax.experimental import pallas as pl
from jax.experimental.pallas import tpu as pltpu


def _timestep_embedding_kernel(x_ref, w1_ref, b1_ref, w2_ref, b2_ref, o_ref):
    # linear_1: (TB, Din) @ (Din, Dout), f32 accumulation on the MXU.
    h = jnp.dot(x_ref[...], w1_ref[...], preferred_element_type=jnp.float32)
    h = h + b1_ref[...]
    # SiLU: x * sigmoid(x). Sigmoid lowers to the EUP (free slot under MXU/DMA).
    h = h * jax.nn.sigmoid(h)
    # linear_2: (TB, Dout) @ (Dout, Dout), f32 accumulation on the MXU.
    o = jnp.dot(h.astype(w2_ref.dtype), w2_ref[...],
                preferred_element_type=jnp.float32)
    o = o + b2_ref[...]
    o_ref[...] = o.astype(o_ref.dtype)


_GRIDLESS_MAX_ROWS = 4096          # single-step (no grid) up to this many rows
_VMEM_SOFT_CAP = 48 * 1024 * 1024  # stay inside v7x's 64 MiB physical VMEM


def _round_up(n, m):
    return (n + m - 1) // m * m


def timestep_embedding(x, w1, b1, w2, b2, *, block_b=None,
                       compute_dtype=jnp.bfloat16):
    """Fused Linear -> SiLU -> Linear (PyTorch TimestepEmbedding forward).

    x:  (B, Din)
    w1: (Din, Dout)   (pre-transposed nn.Linear weight)
    b1: (Dout,)
    w2: (Dout, Dout)  (pre-transposed nn.Linear weight)
    b2: (Dout,)
    """
    B, Din = x.shape
    Dout = w1.shape[1]
    out_dtype = x.dtype

    # MXU operands in a native matmul dtype (bf16 default); bias add + SiLU
    # stay in f32 inside the kernel, output is cast back to x.dtype.
    xc = x.astype(compute_dtype)
    w1c = w1.astype(compute_dtype)
    w2c = w2.astype(compute_dtype)
    b1c = b1.reshape(1, Dout).astype(jnp.float32)
    b2c = b2.reshape(1, Dout).astype(jnp.float32)

    out_shape = jax.ShapeDtypeStruct((B, Dout), out_dtype)
    vmem = pl.BlockSpec(memory_space=pltpu.MemorySpace.VMEM)

    bpe_in = jnp.dtype(compute_dtype).itemsize
    bpe_out = jnp.dtype(out_dtype).itemsize

    def vmem_estimate(rows):
        # x tile (lane-padded), f32 intermediate, output tile (double-buffered
        # tiles), plus the resident weights/biases. Conservative over-estimate.
        x_tile = rows * max(Din, 128) * bpe_in
        o_tile = rows * max(Dout, 128) * bpe_out
        h_tile = rows * max(Dout, 128) * 4
        weights = (max(Din, 8) * Dout + Dout * Dout) * bpe_in + 2 * Dout * 4
        return 2 * (x_tile + o_tile) + h_tile + weights

    def vmem_limit(rows):
        return int(min(_VMEM_SOFT_CAP, max(16 << 20, 2 * vmem_estimate(rows))))

    if block_b is None and B <= _GRIDLESS_MAX_ROWS:
        # Overhead-bound regime: no grid, no pipeline bookkeeping; one DMA-in /
        # compute / DMA-out with every operand a whole-array VMEM ref.
        return pl.pallas_call(
            _timestep_embedding_kernel,
            out_shape=out_shape,
            in_specs=[vmem, vmem, vmem, vmem, vmem],
            out_specs=vmem,
            compiler_params=pltpu.CompilerParams(
                vmem_limit_bytes=vmem_limit(B)),
        )(xc, w1c, b1c, w2c, b2c)

    if block_b is None:
        # Few, large steps: enough to overlap input prefetch with output
        # writeback and (on v7x) keep both TensorCores busy via an even-length
        # "parallel" grid; never more steps than needed (each ~0.35 us).
        n_steps = pl.cdiv(B, _GRIDLESS_MAX_ROWS)
        n_steps = n_steps + (n_steps % 2)          # even -> balanced on 2 TCs
        block_b = _round_up(pl.cdiv(B, n_steps), 8)
    else:
        block_b = _round_up(min(block_b, B), 8)

    grid = (pl.cdiv(B, block_b),)
    return pl.pallas_call(
        _timestep_embedding_kernel,
        out_shape=out_shape,
        grid=grid,
        in_specs=[
            # x tiled over rows; Din=32 left lane-sparse on purpose (padding in
            # HBM would quadruple input DMA for zero gain).
            pl.BlockSpec((block_b, Din), lambda i: (i, 0)),
            # Weights / biases: whole-array VMEM residents (no per-step block
            # bookkeeping, no double-buffering of constants).
            vmem, vmem, vmem, vmem,
        ],
        # Lane-dense (Dout=128) output block -> unmasked stores.
        out_specs=pl.BlockSpec((block_b, Dout), lambda i: (i, 0)),
        compiler_params=pltpu.CompilerParams(
            dimension_semantics=("parallel",),
            vmem_limit_bytes=vmem_limit(block_b)),
    )(xc, w1c, b1c, w2c, b2c)


def reference(x, w1, b1, w2, b2):
    h = x @ w1 + b1.reshape(1, -1)
    h = h * jax.nn.sigmoid(h)
    return h @ w2 + b2.reshape(1, -1)


if __name__ == "__main__":
    # Module shapes: in_features=32, out_features=128.
    Din, Dout = 32, 128

    key = jax.random.PRNGKey(0)
    kx, kw1, kb1, kw2, kb2, kxb = jax.random.split(key, 6)

    # Synthetic params, uniform in [-1/sqrt(fan_in), 1/sqrt(fan_in)]
    # (same distribution shape as nn.Linear default init).
    w1 = jax.random.uniform(kw1, (Din, Dout), dtype=jnp.float32,
                            minval=-1.0 / Din ** 0.5, maxval=1.0 / Din ** 0.5)
    b1 = jax.random.uniform(kb1, (Dout,), dtype=jnp.float32,
                            minval=-1.0 / Din ** 0.5, maxval=1.0 / Din ** 0.5)
    w2 = jax.random.uniform(kw2, (Dout, Dout), dtype=jnp.float32,
                            minval=-1.0 / Dout ** 0.5, maxval=1.0 / Dout ** 0.5)
    b2 = jax.random.uniform(kb2, (Dout,), dtype=jnp.float32,
                            minval=-1.0 / Dout ** 0.5, maxval=1.0 / Dout ** 0.5)

    # --- Path 1: small batch, gridless whole-array VMEM call.
    B_small = 8
    x = jax.random.normal(kx, (B_small, Din), dtype=jnp.float32)
    ref = reference(x, w1, b1, w2, b2)

    # strict-f32 numerics check
    out_f32 = jax.block_until_ready(
        timestep_embedding(x, w1, b1, w2, b2, compute_dtype=jnp.float32))
    assert out_f32.shape == (B_small, Dout)
    assert jnp.allclose(out_f32, ref, atol=1e-5, rtol=1e-5)

    # default bf16-operand path (looser tolerance vs f32 reference)
    out_bf16 = jax.block_until_ready(timestep_embedding(x, w1, b1, w2, b2))
    assert out_bf16.shape == (B_small, Dout)
    assert jnp.allclose(out_bf16, ref, atol=5e-2, rtol=5e-2)

    # --- Path 2: batched/tiled path (small shapes; block_b forced to exercise
    # the grid, weights VMEM-resident, "parallel" batch axis).
    B_big = 64
    xb = jax.random.normal(kxb, (B_big, Din), dtype=jnp.float32)
    ref_b = reference(xb, w1, b1, w2, b2)

    out_b_f32 = jax.block_until_ready(
        timestep_embedding(xb, w1, b1, w2, b2, block_b=16,
                           compute_dtype=jnp.float32))
    assert out_b_f32.shape == (B_big, Dout)
    assert jnp.allclose(out_b_f32, ref_b, atol=1e-5, rtol=1e-5)

    out_b_bf16 = jax.block_until_ready(
        timestep_embedding(xb, w1, b1, w2, b2, block_b=16))
    assert out_b_bf16.shape == (B_big, Dout)
    assert jnp.allclose(out_b_bf16, ref_b, atol=5e-2, rtol=5e-2)

    print("KERNEL_OK")
</pallas_src>

<mosaic_0001>
module attributes {stable_mosaic.version = 11 : i64} {
  func.func @_timestep_embedding_kernel(%arg0: memref<8x32xf32, #tpu.memory_space<vmem>>, %arg1: memref<32x128xf32, #tpu.memory_space<vmem>>, %arg2: memref<1x128xf32, #tpu.memory_space<vmem>>, %arg3: memref<128x128xf32, #tpu.memory_space<vmem>>, %arg4: memref<1x128xf32, #tpu.memory_space<vmem>>, %arg5: memref<8x128xf32, #tpu.memory_space<vmem>>) attributes {dimension_semantics = [], scalar_prefetch = 0 : i64, scratch_operands = 0 : i64, tpu.core_type = #tpu.core_type<tc>} {
    %c0 = arith.constant 0 : index
    %c0_0 = arith.constant 0 : index
    %0 = vector.load %arg0[%c0, %c0_0] : memref<8x32xf32, #tpu.memory_space<vmem>>, vector<8x32xf32>
    %c0_1 = arith.constant 0 : index
    %c0_2 = arith.constant 0 : index
    %1 = vector.load %arg1[%c0_1, %c0_2] : memref<32x128xf32, #tpu.memory_space<vmem>>, vector<32x128xf32>
    %cst = arith.constant dense<0.000000e+00> : vector<8x128xf32>
    %2 = tpu.matmul %0, %1, %cst {dimension_numbers = #tpu.dot_dimension_numbers<[1], [0], [0], [1], [0, 0, 1, 1], [], []>} : vector<8x32xf32>, vector<32x128xf32>, vector<8x128xf32> -> vector<8x128xf32>
    %c0_3 = arith.constant 0 : index
    %c0_4 = arith.constant 0 : index
    %3 = vector.load %arg2[%c0_3, %c0_4] : memref<1x128xf32, #tpu.memory_space<vmem>>, vector<1x128xf32>
    %4 = vector.broadcast %3 : vector<1x128xf32> to vector<8x128xf32>
    %5 = arith.addf %2, %4 : vector<8x128xf32>
    %6 = arith.negf %5 : vector<8x128xf32>
    %7 = math.exp %6 : vector<8x128xf32>
    %cst_5 = arith.constant 1.000000e+00 : f32
    %8 = vector.broadcast %cst_5 : f32 to vector<8x128xf32>
    %9 = arith.addf %8, %7 : vector<8x128xf32>
    %10 = arith.divf %8, %9 : vector<8x128xf32>
    %11 = arith.mulf %5, %10 : vector<8x128xf32>
    %c0_6 = arith.constant 0 : index
    %c0_7 = arith.constant 0 : index
    %12 = vector.load %arg3[%c0_6, %c0_7] : memref<128x128xf32, #tpu.memory_space<vmem>>, vector<128x128xf32>
    %cst_8 = arith.constant dense<0.000000e+00> : vector<8x128xf32>
    %13 = tpu.matmul %11, %12, %cst_8 {dimension_numbers = #tpu.dot_dimension_numbers<[1], [0], [0], [1], [0, 0, 1, 1], [], []>} : vector<8x128xf32>, vector<128x128xf32>, vector<8x128xf32> -> vector<8x128xf32>
    %c0_9 = arith.constant 0 : index
    %c0_10 = arith.constant 0 : index
    %14 = vector.load %arg4[%c0_9, %c0_10] : memref<1x128xf32, #tpu.memory_space<vmem>>, vector<1x128xf32>
    %15 = vector.broadcast %14 : vector<1x128xf32> to vector<8x128xf32>
    %16 = arith.addf %13, %15 : vector<8x128xf32>
    %c0_11 = arith.constant 0 : index
    %c0_12 = arith.constant 0 : index
    %17 = vector.load %arg5[%c0_11, %c0_12] : memref<8x128xf32, #tpu.memory_space<vmem>>, vector<8x128xf32>
    tpu.vector_store %arg5[%c0_11, %c0_12], %16 {strides = array<i32>} : memref<8x128xf32, #tpu.memory_space<vmem>>, vector<8x128xf32>,
    return
  }
}

</mosaic_0001>

<bundles_post_ra>
// kernel: tpu_custom_call.1
= control target key start
LH: loop header
LB: loop body
LE: loop exit
PB: predicated region body
PF: predicated region fallthrough
CT: control target
= control target key end

     0   :  { %10 = vsyncpa [#allocation3], 0  ;;  %s571_s0 = inlined_call_operand.hbm [shape: f32[8,32], index: 0, kind: input, shape index: {}]   ;;  %s572_s1 = inlined_call_operand.hbm [shape: f32[32,128], index: 1, kind: input, shape index: {}]   ;;  %s573_s2 = inlined_call_operand.vmem [shape: f32[1,128], index: 2, kind: input, shape index: {}]   ;;  %s574_s3 = inlined_call_operand.hbm [shape: f32[128,128], index: 3, kind: input, shape index: {}]   ;;  %s575_s4 = inlined_call_operand.vmem [shape: f32[1,128], index: 4, kind: input, shape index: {}]   ;;  %s576_s5 = inlined_call_operand.hbm [shape: f32[8,128], index: 5, kind: output, shape index: {}]  }
   0x1   :  { %11 = vsyncpa [#allocation6], 0 }
   0x2   :  { %12 = vsyncpa [#allocation4], 0  ;;  %s472_s18 = smov [#allocation5]   ;;  %s378_s22 = scalar_lea.hbm %s572_s1, 512 }
   0x3   :  { %s28_s19 = sshll.u32 %s472_s18, 4  ;;  %p379_p0 = scmp.ne.s32.totalorder %s572_s1, %s378_s22  ;;  %s29_s19 = int_to_ptr.vmem [resolvable:$true] %s28_s19 }
   0x4   :  { %p382_p1 = scmp.lt.u32.totalorder %s378_s22, %s572_s1 }
   0x6   :  { %p384_p2 = pnand %p382_p1, %p379_p0 }
   0x8   :  { %387 = shalt.err (!%p384_p2)
}
   0x9   :  { %s388_s27 = scalar_lea.vmem %s29_s19, 512  ;;  %p393_p4 = scmp.lt.s32.totalorder %s29_s19, %s29_s19 }
   0xa   :  { %p389_p3 = scmp.ne.s32.totalorder %s29_s19, %s388_s27  ;;  %p394_p5 = scmp.lt.s32.totalorder %s388_s27, %s388_s27 }
   0xc   :  { %p395_p6 = por %p394_p5, %p393_p4 }
   0xe   :  { %p396_p7 = pnand %p395_p6, %p389_p3 }
  0x10   :  { %399 = shalt.err (!%p396_p7)
}
  0x11   :  { %s473_s28 = smov 128   ;;  %s474_s29 = smov 8  }
  0x12   :  { %34 = dma.hbm_to_vmem [thread:$0]  %s572_s1, 512, %s29_s19, [#allocation6], %s473_s28, %s473_s28, %s474_s29  }
  0x13   :  { %s475_s7 = smov [#allocation2]   ;;  %s476_s9 = smov [#allocation7]  }
  0x14   :  { %s19_s8 = sshll.u32 %s475_s7, 4  ;;  %s42_s10 = sshll.u32 %s476_s9, 4  ;;  %s20_s8 = int_to_ptr.vmem [resolvable:$true] %s19_s8  ;;  %s43_s10 = int_to_ptr.vmem [resolvable:$true] %s42_s10 }
  0x15   :  { %s400_s13 = scalar_lea.hbm %s571_s0, 128 }
  0x16   :  { %p401_p8 = scmp.ne.s32.totalorder %s571_s0, %s400_s13  ;;  %p404_p9 = scmp.lt.u32.totalorder %s400_s13, %s571_s0 }
  0x18   :  { %p406_p10 = pnand %p404_p9, %p401_p8 }
  0x1a   :  { %409 = shalt.err (!%p406_p10)
}
  0x1b   :  { %s410_s1 = scalar_lea.vmem %s20_s8, 128  ;;  %p415_p12 = scmp.lt.s32.totalorder %s20_s8, %s20_s8 }
  0x1c   :  { %p411_p11 = scmp.ne.s32.totalorder %s20_s8, %s410_s1  ;;  %p416_p13 = scmp.lt.s32.totalorder %s410_s1, %s410_s1 }
  0x1e   :  { %p417_p0 = por %p416_p13, %p415_p12 }
  0x20   :  { %p418_p1 = pnand %p417_p0, %p411_p11 }
  0x22   :  { %421 = shalt.err (!%p418_p1)
}
  0x23   :  { %22 = dma.hbm_to_vmem [thread:$0]  %s571_s0, 128, %s20_s8, [#allocation3]  }
  0x24   :  { %s422_s22 = scalar_lea.hbm %s574_s3, 2048 }
  0x25   :  { %p423_p2 = scmp.ne.s32.totalorder %s574_s3, %s422_s22  ;;  %p426_p3 = scmp.lt.u32.totalorder %s422_s22, %s574_s3 }
  0x27   :  { %p428_p4 = pnand %p426_p3, %p423_p2 }
  0x29   :  { %431 = shalt.err (!%p428_p4)
}
  0x2a   :  { %s432_s27 = scalar_lea.vmem %s43_s10, 2048  ;;  %p437_p6 = scmp.lt.s32.totalorder %s43_s10, %s43_s10 }
  0x2b   :  { %p433_p5 = scmp.ne.s32.totalorder %s43_s10, %s432_s27  ;;  %p438_p7 = scmp.lt.s32.totalorder %s432_s27, %s432_s27 }
  0x2d   :  { %p439_p8 = por %p438_p7, %p437_p6 }
  0x2f   :  { %p440_p9 = pnand %p439_p8, %p433_p5 }
  0x31   :  { %443 = shalt.err (!%p440_p9)
}
  0x32   :  { %48 = dma.hbm_to_vmem [thread:$0]  %s574_s3, 2048, %s43_s10, [#allocation6], %s473_s28, %s473_s28, %s474_s29  }
  0x33   :  { %466 = dma.done.wait [#allocation3], 128  }
  0x34   :  { %467 = vsyncadd [#allocation3], 4294967168 }
  0x35   :  { %468 = dma.done.wait [#allocation6], 2560  }
  0x36   :  { %469 = vsyncadd [#allocation6], 4294964736  ;;  %v477_v0 = vmov 0.0|0.0   ;;  %vm478_vm0 = vmmov 0   ;;  %v479_v1 = vmov 0.0   ;;  %v61_v2 = vld [vmem:[#allocation5] sm:$0xff] }
  0x37   :  { %335 = vmatprep.subr.bf16.mxu0 %v477_v0  ;;  %297 = vmatprep.mubr.msk.f32.mxu0 %vm478_vm0, %v479_v1  ;;  %v62_v3 = vld [vmem:[#allocation5 + $0x8] sm:$0xff]  ;;  %v63_v4 = vld [vmem:[#allocation5 + $0x10] sm:$0xff]  ;;  %v64_v6 = vld [vmem:[#allocation5 + $0x18] sm:$0xff]  ;;  %vm72_vm1 = vcmask 261120   ;;  %s480_s7 = smov [#allocation8]  }
  0x38   :  { %341 = vmatprep.subr.bf16.mxu1 %v477_v0  ;;  %332 = vmatprep.mubr.msk.f32.mxu1 %vm478_vm0, %v479_v1  ;;  %v336_v5 = vpack.c.bf16 %v62_v3, %v61_v2  ;;  %v339_v7 = vpack.c.bf16 %v64_v6, %v63_v4  ;;  %v60_v8 = vld [vmem:[#allocation2] sm:$0xff]  ;;  %v153_v9 = vld [vmem:[#allocation7] sm:$0xff]  ;;  %v154_v10 = vld [vmem:[#allocation7 + $0x8] sm:$0xff]  ;;  %s253_s8 = sshll.u32 %s480_s7, 4  ;;  %s254_s8 = int_to_ptr.vmem [resolvable:$true] %s253_s8 }
  0x39   :  { %v342_v11 = vpack.c.bf16 %v154_v10, %v153_v9  ;;  %v155_v12 = vld [vmem:[#allocation7 + $0x10] sm:$0xff]  ;;  %v156_v13 = vld [vmem:[#allocation7 + $0x18] sm:$0xff]  ;;  %v157_v15 = vld [vmem:[#allocation7 + $0x20] sm:$0xff]  ;;  %p449_p11 = scmp.lt.s32.totalorder %s254_s8, %s254_s8 }
  0x3a   :  { %337 = vmatpush3.bf16.msra.mxu0 %v336_v5  ;;  %v345_v14 = vpack.c.bf16 %v156_v13, %v155_v12  ;;  %v158_v16 = vld [vmem:[#allocation7 + $0x28] sm:$0xff]  ;;  %v159_v18 = vld [vmem:[#allocation7 + $0x30] sm:$0xff]  ;;  %v160_v19 = vld [vmem:[#allocation7 + $0x38] sm:$0xff] }
  0x3b   :  { %338 = vmatprep.subr.bf16.mxu0 %v477_v0  ;;  %343 = vmatpush3.bf16.msra.mxu1 %v342_v11  ;;  %v348_v17 = vpack.c.bf16 %v158_v16, %v157_v15  ;;  %v351_v20 = vpack.c.bf16 %v160_v19, %v159_v18  ;;  %v161_v21 = vld [vmem:[#allocation7 + $0x40] sm:$0xff]  ;;  %v162_v22 = vld [vmem:[#allocation7 + $0x48] sm:$0xff]  ;;  %v163_v24 = vld [vmem:[#allocation7 + $0x50] sm:$0xff] }
  0x3c   :  { %344 = vmatprep.subr.bf16.mxu1 %v477_v0  ;;  %v354_v23 = vpack.c.bf16 %v162_v22, %v161_v21  ;;  %v164_v25 = vld [vmem:[#allocation7 + $0x58] sm:$0xff]  ;;  %v165_v27 = vld [vmem:[#allocation7 + $0x60] sm:$0xff]  ;;  %v166_v28 = vld [vmem:[#allocation7 + $0x68] sm:$0xff] }
  0x3d   :  { %v357_v26 = vpack.c.bf16 %v164_v25, %v163_v24  ;;  %v360_v29 = vpack.c.bf16 %v166_v28, %v165_v27  ;;  %v167_v30 = vld [vmem:[#allocation7 + $0x70] sm:$0xff]  ;;  %v168_v31 = vld [vmem:[#allocation7 + $0x78] sm:$0xff] }
  0x3e   :  { %340 = vmatpush3.bf16.msra.mxu0 %v339_v7  ;;  %v363_v32 = vpack.c.bf16 %v168_v31, %v167_v30  ;;  %v263_v33 = vld [vmem:[%s573_s2] ss:$0 sm:$0xff]  ;;  %s444_s2 = scalar_lea.vmem %s254_s8, 128 }
  0x3f   :  { %346 = vmatpush3.bf16.msra.mxu1 %v345_v14  ;;  %v266_v42 = vld [vmem:[%s575_s4] ss:$0 sm:$0xff]  ;;  %p445_p10 = scmp.ne.s32.totalorder %s254_s8, %s444_s2  ;;  %p450_p12 = scmp.lt.s32.totalorder %s444_s2, %s444_s2 }
  0x40   :  { %347 = vmatprep.subr.bf16.mxu1 %v477_v0 }
  0x41   :  { %298 = vmatmul.mubr.msk.f32.vlgmr.msra.gmra.mrb[0].mxu0 %vm72_vm1, %v60_v8  ;;  %p451_p13 = por %p450_p12, %p449_p11 }
  0x43   :  { %349 = vmatpush3.bf16.msra.mxu1 %v348_v17  ;;  %p452_p0 = pnand %p451_p13, %p445_p10 }
  0x44   :  { %350 = vmatprep.subr.bf16.mxu1 %v477_v0 }
  0x47   :  { %352 = vmatpush3.bf16.msra.mxu1 %v351_v20 }
  0x48   :  { %353 = vmatprep.subr.bf16.mxu1 %v477_v0 }
  0x4b   :  { %355 = vmatpush3.bf16.msra.mxu1 %v354_v23 }
  0x4c   :  { %356 = vmatprep.subr.bf16.mxu1 %v477_v0 }
  0x4f   :  { %358 = vmatpush3.bf16.msra.mxu1 %v357_v26 }
  0x50   :  { %359 = vmatprep.subr.bf16.mxu1 %v477_v0 }
  0x53   :  { %361 = vmatpush3.bf16.msra.mxu1 %v360_v29 }
  0x54   :  { %362 = vmatprep.subr.bf16.mxu1 %v477_v0 }
  0x57   :  { %364 = vmatpush3.bf16.msra.mxu1 %v363_v32 }
 0x114   :  { %v142_v34 = vpop.f32.mrb[0].mxu0 }
 0x115   :  { %v143_v35 = vadd.f32 %v263_v33, %v142_v34  ;;  %v299_v36 = vpop.f32.mrb[1].mxu0 }
 0x117   :  { %v265_v37 = vmul.f32 -1.442695, %v143_v35 }
 0x119   :  { %374 = vpow2.f32 %v265_v37 }
 0x123   :  { %v375_v38 = vpop.eup %374 }
 0x124   :  { %v149_v39 = vadd.f32 1.0, %v375_v38 }
 0x126   :  { %376 = vrcp.f32 %v149_v39 }
 0x130   :  { %v377_v40 = vpop.eup %376 }
 0x131   :  { %v152_v41 = vmul.f32 %v377_v40, %v143_v35 }
 0x133   :  { %333 = vmatmul.mubr.f32.vlgmr.msra.gmra.mrb[0].mxu1 %v152_v41 }
 0x206   :  { %v242_v43 = vpop.f32.mrb[0].mxu1 }
 0x207   :  { %v243_v44 = vadd.f32 %v266_v42, %v242_v43  ;;  %v334_v45 = vpop.f32.mrb[1].mxu1 }
 0x209   :  { %246 = vst [vmem:[#allocation8] sm:$0xff] %v243_v44 }
 0x20a   :  { %455 = shalt.err (!%p452_p0)
}
 0x20b   :  { %s456_s11 = scalar_lea.hbm %s576_s5, 128 }
 0x20c   :  { %p457_p1 = scmp.ne.s32.totalorder %s576_s5, %s456_s11  ;;  %p460_p2 = scmp.lt.u32.totalorder %s456_s11, %s576_s5 }
 0x20e   :  { %p462_p3 = pnand %p460_p2, %p457_p1 }
 0x210   :  { %465 = shalt.err (!%p462_p3)
}
 0x211   :  { %256 = dma.vmem_to_hbm [thread:$0]  %s254_s8, 128, %s576_s5, [#allocation4]  }
 0x212   :  { %470 = dma.done.wait [#allocation4], 128  }
 0x213   :  { %471 = vsyncadd [#allocation4], 4294967168 }
 0x214   :  { %260 = vsyncpa [#allocation3], 1 }
 0x215   :  { %261 = vsyncpa [#allocation6], 1 }
 0x216   :  { %262 = vsyncpa [#allocation4], 1 }

</bundles_post_ra>
